<compile_context>
chip_gen: v5e
topology: v5e:2x2
jax: 0.10.0
libtpu: 0.0.40
codegen_flags: <defaults>
</compile_context>

<pallas_src>
import jax
import jax.numpy as jnp
from jax import lax
from jax.experimental import pallas as pl
from jax.experimental.pallas import tpu as pltpu


def addn_kernel(x_ref, o_ref, acc_ref):
    # x_ref : (c_chunk, H, NT)   o_ref : (H, NT)   acc_ref : (H, NT) f32
    c = pl.program_id(1)

    @pl.when(c == 0)
    def _init():
        acc_ref[...] = jnp.zeros_like(acc_ref)

    # Channel-chunk partial sum, accumulated in f32 (VPU adds over lane-dense vregs).
    acc_ref[...] += jnp.sum(x_ref[...].astype(jnp.float32), axis=0)

    @pl.when(c == pl.num_programs(1) - 1)
    def _finalize():
        s = acc_ref[...]                                    # (H, NT)
        ss = jnp.sum(s * s, axis=0, keepdims=True)          # reduce over H -> (1, NT)
        # rsqrt(max(ss, eps^2)) == 1 / max(||s||, eps) in f32; EUP op, no divide.
        inv = lax.rsqrt(jnp.maximum(ss, 1e-24))
        o_ref[...] = (s * inv).astype(o_ref.dtype)


def _lane_tile(n):
    # Prefer lane tiles that are large multiples of 128 (unmasked stores,
    # amortized per-step overhead).  Full extent is always a legal block.
    if n % 128 == 0:
        for t in (2048, 1024, 512, 256, 128):
            if n % t == 0:
                return t
    return n


def _c_chunk(c, h, nt, itemsize, budget_bytes=8 << 20):
    # Bound the double-buffered input block: 2 * c_chunk * H * NT * itemsize.
    max_c = max(1, budget_bytes // (2 * h * nt * itemsize))
    if c <= max_c:
        return c
    for d in range(int(max_c), 0, -1):   # largest divisor of C within budget
        if c % d == 0:
            return d
    return 1


def addn_forward(x):
    B, C, H, W = x.shape
    N = B * W

    # Layout plumbing (wrapper-side, not compute): fold batch into lanes.
    #   (B, C, H, W) -> (C, H, B, W) -> (C, H, B*W)
    xt = jnp.transpose(x, (1, 2, 0, 3)).reshape(C, H, N)

    nt = _lane_tile(N)
    cc = _c_chunk(C, H, nt, jnp.dtype(x.dtype).itemsize)
    grid = (N // nt, C // cc)            # lane tiles (parallel), C chunks (reduction)

    out = pl.pallas_call(
        addn_kernel,
        out_shape=jax.ShapeDtypeStruct((H, N), x.dtype),
        grid=grid,
        in_specs=[pl.BlockSpec((cc, H, nt), lambda n, c: (c, 0, n))],
        out_specs=pl.BlockSpec((H, nt), lambda n, c: (0, n)),
        scratch_shapes=[pltpu.VMEM((H, nt), jnp.float32)],
        compiler_params=pltpu.CompilerParams(
            dimension_semantics=("parallel", "arbitrary")),
    )(xt)

    # Unfold lanes back: (H, B*W) -> (H, B, W) -> (B, H, W)
    return jnp.transpose(out.reshape(H, B, W), (1, 0, 2))


def addn_reference(x):
    s = jnp.sum(x, axis=1)
    norm = jnp.sqrt(jnp.sum(s * s, axis=1, keepdims=True))
    return s / jnp.maximum(norm, 1e-12)


if __name__ == "__main__":
    key = jax.random.PRNGKey(0)
    x = jax.random.normal(key, (2, 4, 16, 16), dtype=jnp.float32)

    out = jax.block_until_ready(addn_forward(x))
    ref = addn_reference(x)

    assert out.shape == (2, 16, 16)
    assert jnp.allclose(out, ref, atol=1e-5, rtol=1e-5)

    print("KERNEL_OK")
</pallas_src>

<mosaic_0001>
module attributes {stable_mosaic.version = 11 : i64} {
  func.func @addn_kernel(%arg0: i32, %arg1: i32, %arg2: memref<4x16x32xf32, #tpu.memory_space<vmem>>, %arg3: memref<16x32xf32, #tpu.memory_space<vmem>>, %arg4: memref<16x32xf32, #tpu.memory_space<vmem>>) attributes {dimension_semantics = [#tpu.dimension_semantics<parallel>, #tpu.dimension_semantics<arbitrary>], iteration_bounds = array<i64: 1, 1>, scalar_prefetch = 0 : i64, scratch_operands = 1 : i64, tpu.core_type = #tpu.core_type<tc>, window_params = [{transform_indices = @transform_0, window_bounds = array<i64: 4, 16, 32>}, {transform_indices = @transform_1, window_bounds = array<i64: 16, 32>}]} {
    %c0_i32 = arith.constant 0 : i32
    %0 = arith.cmpi eq, %arg1, %c0_i32 : i32
    %1 = arith.extui %0 : i1 to i32
    %c0_i32_0 = arith.constant 0 : i32
    %2 = arith.cmpi ne, %1, %c0_i32_0 : i32
    scf.if %2 {
      %cst_9 = arith.constant 0.000000e+00 : f32
      %11 = vector.broadcast %cst_9 : f32 to vector<16x32xf32>
      %c0_10 = arith.constant 0 : index
      %c0_11 = arith.constant 0 : index
      %12 = vector.load %arg4[%c0_10, %c0_11] : memref<16x32xf32, #tpu.memory_space<vmem>>, vector<16x32xf32>
      tpu.vector_store %arg4[%c0_10, %c0_11], %11 {strides = array<i32>} : memref<16x32xf32, #tpu.memory_space<vmem>>, vector<16x32xf32>,
    } else {
    }
    %c0 = arith.constant 0 : index
    %c0_1 = arith.constant 0 : index
    %3 = vector.load %arg4[%c0, %c0_1] : memref<16x32xf32, #tpu.memory_space<vmem>>, vector<16x32xf32>
    %c0_2 = arith.constant 0 : index
    %c0_3 = arith.constant 0 : index
    %c0_4 = arith.constant 0 : index
    %4 = vector.load %arg2[%c0_2, %c0_3, %c0_4] : memref<4x16x32xf32, #tpu.memory_space<vmem>>, vector<4x16x32xf32>
    %cst = arith.constant dense<0.000000e+00> : vector<16x32xf32>
    %5 = vector.multi_reduction <add>, %4, %cst [0] : vector<4x16x32xf32> to vector<16x32xf32>
    %6 = arith.addf %3, %5 : vector<16x32xf32>
    %c0_5 = arith.constant 0 : index
    %c0_6 = arith.constant 0 : index
    %7 = vector.load %arg4[%c0_5, %c0_6] : memref<16x32xf32, #tpu.memory_space<vmem>>, vector<16x32xf32>
    tpu.vector_store %arg4[%c0_5, %c0_6], %6 {strides = array<i32>} : memref<16x32xf32, #tpu.memory_space<vmem>>, vector<16x32xf32>,
    %c0_i32_7 = arith.constant 0 : i32
    %8 = arith.cmpi eq, %arg1, %c0_i32_7 : i32
    %9 = arith.extui %8 : i1 to i32
    %c0_i32_8 = arith.constant 0 : i32
    %10 = arith.cmpi ne, %9, %c0_i32_8 : i32
    scf.if %10 {
      %c0_9 = arith.constant 0 : index
      %c0_10 = arith.constant 0 : index
      %11 = vector.load %arg4[%c0_9, %c0_10] : memref<16x32xf32, #tpu.memory_space<vmem>>, vector<16x32xf32>
      %12 = arith.mulf %11, %11 : vector<16x32xf32>
      %cst_11 = arith.constant dense<0.000000e+00> : vector<32xf32>
      %13 = vector.multi_reduction <add>, %12, %cst_11 [0] : vector<16x32xf32> to vector<32xf32>
      %14 = vector.shape_cast %13 : vector<32xf32> to vector<1x32xf32>
      %cst_12 = arith.constant 1.000000e-24 : f32
      %15 = vector.broadcast %cst_12 : f32 to vector<1x32xf32>
      %16 = arith.maximumf %14, %15 : vector<1x32xf32>
      %17 = math.rsqrt %16 : vector<1x32xf32>
      %18 = vector.broadcast %17 : vector<1x32xf32> to vector<16x32xf32>
      %19 = arith.mulf %11, %18 : vector<16x32xf32>
      %c0_13 = arith.constant 0 : index
      %c0_14 = arith.constant 0 : index
      %20 = vector.load %arg3[%c0_13, %c0_14] : memref<16x32xf32, #tpu.memory_space<vmem>>, vector<16x32xf32>
      tpu.vector_store %arg3[%c0_13, %c0_14], %19 {strides = array<i32>} : memref<16x32xf32, #tpu.memory_space<vmem>>, vector<16x32xf32>,
    } else {
    }
    return
  }
  func.func @transform_0(%arg0: i32, %arg1: i32) -> (i32, i32, i32) {
    %c0_i32 = arith.constant 0 : i32
    %c0_i32_0 = arith.constant 0 : i32
    return %arg1, %c0_i32, %arg0 : i32, i32, i32
  }
  func.func @transform_1(%arg0: i32, %arg1: i32) -> (i32, i32) {
    %c0_i32 = arith.constant 0 : i32
    %c0_i32_0 = arith.constant 0 : i32
    return %c0_i32, %arg0 : i32, i32
  }
}

</mosaic_0001>

<bundles_post_ra>
// kernel: tpu_custom_call.1
= control target key start
LH: loop header
LB: loop body
LE: loop exit
PB: predicated region body
PF: predicated region fallthrough
CT: control target
= control target key end

     0   :  { %6 = vsyncpa [#allocation4], 0  ;;  %s213_s0 = inlined_call_operand.hbm [shape: f32[4,16,32], index: 0, kind: input, shape index: {}]   ;;  %s214_s1 = inlined_call_operand.hbm [shape: f32[16,32], index: 1, kind: output, shape index: {}]  }
   0x1   :  { %7 = vsyncpa [#allocation5], 0  ;;  %s12_s8 = sshll.u32 %s213_s0, 4  ;;  %s170_s9 = smov [#allocation3]   ;;  %s13_s8 = int_to_ptr.hbm [resolvable:$true] %s12_s8 }
   0x2   :  { %s14_s10 = sshll.u32 %s170_s9, 4  ;;  %s171_s11 = smov 128   ;;  %s15_s10 = int_to_ptr.vmem [resolvable:$true] %s14_s10 }
   0x3   :  { %s172_s12 = smov 8  }
   0x4   :  { %20 = dma.hbm_to_vmem [thread:$0]  %s13_s8, 1024, %s15_s10, [#allocation4], %s171_s11, %s171_s11, %s172_s12  }
   0x5   :  { %166 = dma.done.wait [#allocation4], 1024  }
   0x6   :  { %167 = vsyncadd [#allocation4], 4294966272  ;;  %vm29_vm0 = vcmask 261120   ;;  %v173_v0 = vmov 0.0   ;;  %v34_v1 = vld [vmem:[#allocation3] sm:$0xff]  ;;  %v36_v2 = vld [vmem:[#allocation3 + $0x10] sm:$0xff] }
   0x7   :  { %30 = vst.msk [vmem:[#allocation2] sm:$0xff] %vm29_vm0, %v173_v0  ;;  %v38_v3 = vld [vmem:[#allocation3 + $0x20] sm:$0xff]  ;;  %v40_v4 = vld [vmem:[#allocation3 + $0x30] sm:$0xff]  ;;  %v43_v5 = vsel %vm29_vm0, %v34_v1, 0.0  ;;  %v44_v6 = vsel %vm29_vm0, %v36_v2, 0.0  ;;  %v35_v8 = vld [vmem:[#allocation3 + $0x8] sm:$0xff] }
   0x8   :  { %31 = vst.msk [vmem:[#allocation2 + $0x8] sm:$0xff] %vm29_vm0, %v173_v0  ;;  %v46_v7 = vsel %vm29_vm0, %v38_v3, 0.0  ;;  %v45_v9 = vadd.f32 %v44_v6, %v43_v5  ;;  %v37_v10 = vld [vmem:[#allocation3 + $0x18] sm:$0xff]  ;;  %v39_v11 = vld [vmem:[#allocation3 + $0x28] sm:$0xff]  ;;  %v50_v12 = vsel %vm29_vm0, %v35_v8, 0.0  ;;  %v48_v13 = vsel %vm29_vm0, %v40_v4, 0.0 }
   0x9   :  { %v41_v14 = vld [vmem:[#allocation3 + $0x38] sm:$0xff]  ;;  %v51_v15 = vsel %vm29_vm0, %v37_v10, 0.0  ;;  %v53_v16 = vsel %vm29_vm0, %v39_v11, 0.0  ;;  %s174_s0 = smov [#allocation6]   ;;  %s98_s16 = sshll.u32 %s214_s1, 4  ;;  %s99_s16 = int_to_ptr.hbm [resolvable:$true] %s98_s16 }
   0xa   :  { %v47_v17 = vadd.f32 %v46_v7, %v45_v9  ;;  %v52_v18 = vadd.f32 %v51_v15, %v50_v12  ;;  %v55_v20 = vsel %vm29_vm0, %v41_v14, 0.0  ;;  %s96_s13 = sshll.u32 %s174_s0, 4  ;;  %s97_s13 = int_to_ptr.vmem [resolvable:$true] %s96_s13 }
   0xc   :  { %v49_v21 = vadd.f32 %v48_v13, %v47_v17  ;;  %v54_v22 = vadd.f32 %v53_v16, %v52_v18 }
   0xe   :  { %v32_v19 = vld [vmem:[#allocation2] sm:$0xff]  ;;  %v56_v25 = vadd.f32 %v55_v20, %v54_v22 }
   0xf   :  { %v33_v23 = vld [vmem:[#allocation2 + $0x8] sm:$0xff]  ;;  %v57_v24 = vadd.f32 %v49_v21, %v32_v19 }
  0x10   :  { %v58_v26 = vadd.f32 %v56_v25, %v33_v23 }
  0x11   :  { %59 = vst.msk [vmem:[#allocation2] sm:$0xff] %vm29_vm0, %v57_v24 }
  0x12   :  { %60 = vst.msk [vmem:[#allocation2 + $0x8] sm:$0xff] %vm29_vm0, %v58_v26 }
  0x18   :  { %v64_v27 = vld [vmem:[#allocation2] sm:$0xff] }
  0x19   :  { %v66_v28 = vmul.f32 %v64_v27, %v64_v27  ;;  %v65_v29 = vld [vmem:[#allocation2 + $0x8] sm:$0xff] }
  0x1a   :  { %v67_v30 = vmul.f32 %v65_v29, %v65_v29 }
  0x1b   :  { %v68_v31 = vsel %vm29_vm0, %v66_v28, 0.0 }
  0x1c   :  { %v69_v32 = vsel %vm29_vm0, %v67_v30, 0.0 }
  0x1d   :  { %v70_v33 = vadd.f32 %v69_v32, %v68_v31 }
  0x1f   :  { %v71_v34 = vrot.slane %v70_v33, 4 }
  0x21   :  { %v72_v35 = vadd.f32 %v71_v34, %v70_v33 }
  0x23   :  { %v73_v36 = vrot.slane %v72_v35, 2 }
  0x25   :  { %v74_v37 = vadd.f32 %v73_v36, %v72_v35 }
  0x27   :  { %v75_v38 = vrot.slane %v74_v37, 1 }
  0x29   :  { %v76_v39 = vadd.f32 %v75_v38, %v74_v37 }
  0x2b   :  { %v77_v40 = vmax.f32 %v76_v39, 1e-24 }
  0x2d   :  { %116 = vrsqrt.f32 %v77_v40  ;;  %vm84_vm2 = vweird.f32 %v77_v40 }
  0x33   :  { %v117_v41 = vpop.eup %116 }
  0x34   :  { %v79_v42 = vmul.f32 %v117_v41, %v77_v40  ;;  %vm85_vm1 = vweird.f32 %v117_v41 }
  0x35   :  { %vm86_vm3 = vmor %vm84_vm2, %vm85_vm1 }
  0x36   :  { %v80_v43 = vmul.f32 %v117_v41, %v79_v42 }
  0x38   :  { %v81_v44 = vmul.f32 0.5, %v80_v43 }
  0x3a   :  { %v82_v45 = vsub.f32 1.5, %v81_v44 }
  0x3c   :  { %v83_v46 = vmul.f32 %v117_v41, %v82_v45 }
  0x3e   :  { %v87_v47 = vsel %vm86_vm3, %v117_v41, %v83_v46 }
  0x3f   :  { %v88_v48 = vmul.f32 %v87_v47, %v64_v27  ;;  %v89_v49 = vmul.f32 %v87_v47, %v65_v29 }
  0x41   :  { %90 = vst.msk [vmem:[#allocation6] sm:$0xff] %vm29_vm0, %v88_v48 }
  0x42   :  { %91 = vst.msk [vmem:[#allocation6 + $0x8] sm:$0xff] %vm29_vm0, %v89_v49 }
  0x43   :  { %104 = dma.vmem_to_hbm [thread:$0]  %s97_s13, 256, %s99_s16, [#allocation5], %s171_s11, %s171_s11, %s172_s12  }
  0x44   :  { %168 = dma.done.wait [#allocation5], 256  }
  0x45   :  { %169 = vsyncadd [#allocation5], 4294967040 }
  0x46   :  { %109 = vsyncpa [#allocation4], 1 }
  0x47   :  { %110 = vsyncpa [#allocation5], 1 }

</bundles_post_ra>
